<compile_context>
chip_gen: v7x
topology: tpu7x:2x2x1
jax: 0.10.0
libtpu: 0.0.40
codegen_flags: <defaults>
</compile_context>

<pallas_src>
import functools

import numpy as np
import jax
import jax.numpy as jnp
from jax.experimental import pallas as pl
from jax.experimental.pallas import tpu as pltpu


def dmfunc_kernel(d, yt_ref, wf_ref, b1_ref, w2_ref, b2_ref, ot_ref):
    """Computes one (D, tn) tile of out.T.

    yt_ref : (D, tn)    y.T tile              (matmul dtype, streams over grid)
    wf_ref : (D+H, D)   [B_s ; W1] stacked    (matmul dtype, resident)
    b1_ref : (H, 1)     bias 1                (f32, resident)
    w2_ref : (D, H)     W2                    (matmul dtype, resident)
    b2_ref : (D, 1)     bias 2                (f32, resident)
    ot_ref : (D, tn)    output tile (out.T)   (f32)
    """
    yt = yt_ref[...]
    # One MXU pass for both D-wide weight matrices:
    #   rows [:d]  -> B_s @ y.T      rows [d:] -> W1 @ y.T      (f32 accumulate)
    first = jnp.dot(wf_ref[...], yt, preferred_element_type=jnp.float32)
    lin = first[:d, :]                                      # (D, tn) = (y @ B_s.T).T
    h = jnp.tanh(first[d:, :] + b1_ref[...])                # (H, tn), f32 (EUP)
    net = jnp.dot(w2_ref[...], h.astype(w2_ref.dtype),
                  preferred_element_type=jnp.float32) + b2_ref[...]
    ot_ref[...] = (lin + net).astype(ot_ref.dtype)


def dmfunc_forward(y, B_s, W1, b1, W2, b2, *, tn=256, matmul_dtype=jnp.bfloat16):
    """y: (N, D) f32.  B_s: (D, D).  W1: (H, D), b1: (H,), W2: (D, H), b2: (D,).

    Returns forward(t, y) = y @ B_s.T + tanh(y @ W1.T + b1) @ W2.T + b2, f32.
    """
    N, D = y.shape
    H = W1.shape[0]
    tn = min(tn, N)
    assert N % tn == 0 and tn % 128 == 0, "batch must tile into lane-dense (>=128) blocks"

    # Lane-dense layout: batch on the lane (last) axis.  Transposes here are
    # cheap wrapper-side layout plumbing.
    yt = jnp.asarray(y, jnp.float32).T.astype(matmul_dtype)            # (D, N)
    wf = jnp.concatenate(
        [jnp.asarray(B_s, jnp.float32), jnp.asarray(W1, jnp.float32)], axis=0
    ).astype(matmul_dtype)                                             # (D+H, D)
    w2 = jnp.asarray(W2, jnp.float32).astype(matmul_dtype)             # (D, H)
    b1c = jnp.asarray(b1, jnp.float32).reshape(H, 1)
    b2c = jnp.asarray(b2, jnp.float32).reshape(D, 1)

    grid = (N // tn,)
    out_t = pl.pallas_call(
        functools.partial(dmfunc_kernel, D),
        out_shape=jax.ShapeDtypeStruct((D, N), jnp.float32),
        grid_spec=pltpu.PrefetchScalarGridSpec(
            num_scalar_prefetch=0,
            grid=grid,
            in_specs=[
                pl.BlockSpec((D, tn), lambda i: (0, i)),       # y.T tile (streams)
                pl.BlockSpec((D + H, D), lambda i: (0, 0)),    # [B_s; W1] (resident)
                pl.BlockSpec((H, 1), lambda i: (0, 0)),        # b1        (resident)
                pl.BlockSpec((D, H), lambda i: (0, 0)),        # W2        (resident)
                pl.BlockSpec((D, 1), lambda i: (0, 0)),        # b2        (resident)
            ],
            out_specs=pl.BlockSpec((D, tn), lambda i: (0, i)),
        ),
        compiler_params=pltpu.CompilerParams(
            dimension_semantics=("parallel",),    # batch tiles are independent
        ),
    )(yt, wf, b1c, w2, b2c)
    return out_t.T                                                     # (N, D)


def compute_B_s(vr_s, b):
    """update_B() semantics for the part forward() uses (B_s), in plain JAX.

    Matches PyTorch:  vl_s = pinv(vr_s).conj().T
                      B_s  = (vr_s @ diag(b_clamp) @ vl_s.conj().T).real
    (which simplifies to Re(vr_s @ diag(b_clamp) @ pinv(vr_s)));
    b_clamp clamps only the real part of b to <= 0.
    """
    # TODO(synk): torch.linalg.pinv on complex vr_s has no Pallas equivalent; kept as plain-JAX parameter preprocessing.
    vl_s = jnp.linalg.pinv(vr_s).conj().T
    b_clamp = jnp.minimum(b.real, 0.0) + 1j * b.imag
    B_s = (vr_s @ jnp.diag(b_clamp) @ vl_s.conj().T).real
    return B_s.astype(jnp.float32)


if __name__ == "__main__":
    # State dim D = vr_s.shape[1], hidden H, batch of states N (lane-dense: N % 128 == 0).
    N, D, H = 256, 16, 32

    key = jax.random.PRNGKey(0)
    kvr_r, kvr_i, kb_r, kb_i, kw1, kw2, ky = jax.random.split(key, 7)

    # lim.vr_s : complex (D, D) parameter ; lim.b : complex (D,) parameter
    vr_s = (jax.random.normal(kvr_r, (D, D), jnp.float32)
            + 1j * jax.random.normal(kvr_i, (D, D), jnp.float32)).astype(jnp.complex64)
    b = (jax.random.normal(kb_r, (D,), jnp.float32)
         + 1j * jax.random.normal(kb_i, (D,), jnp.float32)).astype(jnp.complex64)

    # TanhFunc net: Linear(D,H) -> Tanh -> Linear(H,D); weights ~ N(0, 0.1), biases 0.
    W1 = 0.1 * jax.random.normal(kw1, (H, D), jnp.float32)
    b1 = jnp.zeros((H,), jnp.float32)
    W2 = 0.1 * jax.random.normal(kw2, (D, H), jnp.float32)
    b2 = jnp.zeros((D,), jnp.float32)

    # Input batch of states y; t is unused by forward().
    y = jax.random.normal(ky, (N, D), jnp.float32)

    B_s = compute_B_s(vr_s, b)

    # Pure-JAX reference of the PyTorch forward.
    ref = y @ B_s.T + (jnp.tanh(y @ W1.T + b1) @ W2.T + b2)

    # ---- f32-MXU path: tight semantic check against the reference.
    out_f32 = jax.block_until_ready(
        dmfunc_forward(y, B_s, W1, b1, W2, b2, tn=128, matmul_dtype=jnp.float32))
    np.testing.assert_allclose(np.asarray(out_f32), np.asarray(ref), rtol=1e-5, atol=1e-5)

    # ---- bf16-MXU path (default / fast): bf16 inputs can't meet 1e-5 against the
    #      pure-f32 reference, so compare against a reference built from the same
    #      bf16-quantized operands (f32 accumulate).
    out_bf16 = jax.block_until_ready(
        dmfunc_forward(y, B_s, W1, b1, W2, b2, tn=128, matmul_dtype=jnp.bfloat16))
    q = lambda a: a.astype(jnp.bfloat16).astype(jnp.float32)
    h_q = jnp.tanh(q(y) @ q(W1).T + b1)
    ref_q = q(y) @ q(B_s).T + (q(h_q) @ q(W2).T + b2)
    np.testing.assert_allclose(np.asarray(out_bf16), np.asarray(ref_q), rtol=5e-3, atol=5e-3)

    print("KERNEL_OK")
</pallas_src>

<mosaic_0001>
module attributes {stable_mosaic.version = 11 : i64} {
  func.func @dmfunc_kernel(%arg0: i32, %arg1: memref<16x128xf32, #tpu.memory_space<vmem>>, %arg2: memref<48x16xf32, #tpu.memory_space<vmem>>, %arg3: memref<32x1xf32, #tpu.memory_space<vmem>>, %arg4: memref<16x32xf32, #tpu.memory_space<vmem>>, %arg5: memref<16x1xf32, #tpu.memory_space<vmem>>, %arg6: memref<16x128xf32, #tpu.memory_space<vmem>>) attributes {dimension_semantics = [#tpu.dimension_semantics<parallel>], iteration_bounds = array<i64: 2>, scalar_prefetch = 0 : i64, scratch_operands = 0 : i64, tpu.core_type = #tpu.core_type<tc>, window_params = [{transform_indices = @transform_0, window_bounds = array<i64: 16, 128>}, {pipeline_mode = #tpu.pipeline_mode<synchronous>, transform_indices = @transform_1, window_bounds = array<i64: 48, 16>}, {pipeline_mode = #tpu.pipeline_mode<synchronous>, transform_indices = @transform_2, window_bounds = array<i64: 32, 1>}, {pipeline_mode = #tpu.pipeline_mode<synchronous>, transform_indices = @transform_3, window_bounds = array<i64: 16, 32>}, {pipeline_mode = #tpu.pipeline_mode<synchronous>, transform_indices = @transform_4, window_bounds = array<i64: 16, 1>}, {transform_indices = @transform_5, window_bounds = array<i64: 16, 128>}]} {
    %c0 = arith.constant 0 : index
    %c0_0 = arith.constant 0 : index
    %0 = vector.load %arg1[%c0, %c0_0] : memref<16x128xf32, #tpu.memory_space<vmem>>, vector<16x128xf32>
    %c0_1 = arith.constant 0 : index
    %c0_2 = arith.constant 0 : index
    %1 = vector.load %arg2[%c0_1, %c0_2] : memref<48x16xf32, #tpu.memory_space<vmem>>, vector<48x16xf32>
    %cst = arith.constant dense<0.000000e+00> : vector<48x128xf32>
    %2 = tpu.matmul %1, %0, %cst {dimension_numbers = #tpu.dot_dimension_numbers<[1], [0], [0], [1], [0, 0, 1, 1], [], []>} : vector<48x16xf32>, vector<16x128xf32>, vector<48x128xf32> -> vector<48x128xf32>
    %3 = vector.extract_strided_slice %2 {offsets = [0, 0], sizes = [16, 128], strides = [1, 1]} : vector<48x128xf32> to vector<16x128xf32>
    %4 = vector.extract_strided_slice %2 {offsets = [16, 0], sizes = [32, 128], strides = [1, 1]} : vector<48x128xf32> to vector<32x128xf32>
    %c0_3 = arith.constant 0 : index
    %c0_4 = arith.constant 0 : index
    %5 = vector.load %arg3[%c0_3, %c0_4] : memref<32x1xf32, #tpu.memory_space<vmem>>, vector<32x1xf32>
    %6 = vector.broadcast %5 : vector<32x1xf32> to vector<32x128xf32>
    %7 = arith.addf %4, %6 : vector<32x128xf32>
    %8 = math.tanh %7 : vector<32x128xf32>
    %c0_5 = arith.constant 0 : index
    %c0_6 = arith.constant 0 : index
    %9 = vector.load %arg4[%c0_5, %c0_6] : memref<16x32xf32, #tpu.memory_space<vmem>>, vector<16x32xf32>
    %cst_7 = arith.constant dense<0.000000e+00> : vector<16x128xf32>
    %10 = tpu.matmul %9, %8, %cst_7 {dimension_numbers = #tpu.dot_dimension_numbers<[1], [0], [0], [1], [0, 0, 1, 1], [], []>} : vector<16x32xf32>, vector<32x128xf32>, vector<16x128xf32> -> vector<16x128xf32>
    %c0_8 = arith.constant 0 : index
    %c0_9 = arith.constant 0 : index
    %11 = vector.load %arg5[%c0_8, %c0_9] : memref<16x1xf32, #tpu.memory_space<vmem>>, vector<16x1xf32>
    %12 = vector.broadcast %11 : vector<16x1xf32> to vector<16x128xf32>
    %13 = arith.addf %10, %12 : vector<16x128xf32>
    %14 = arith.addf %3, %13 : vector<16x128xf32>
    %c0_10 = arith.constant 0 : index
    %c0_11 = arith.constant 0 : index
    %15 = vector.load %arg6[%c0_10, %c0_11] : memref<16x128xf32, #tpu.memory_space<vmem>>, vector<16x128xf32>
    tpu.vector_store %arg6[%c0_10, %c0_11], %14 {strides = array<i32>} : memref<16x128xf32, #tpu.memory_space<vmem>>, vector<16x128xf32>,
    return
  }
  func.func @transform_0(%arg0: i32) -> (i32, i32) {
    %c0_i32 = arith.constant 0 : i32
    %c0_i32_0 = arith.constant 0 : i32
    return %c0_i32, %arg0 : i32, i32
  }
  func.func @transform_1(%arg0: i32) -> (i32, i32) {
    %c0_i32 = arith.constant 0 : i32
    %c0_i32_0 = arith.constant 0 : i32
    %c0_i32_1 = arith.constant 0 : i32
    return %c0_i32, %c0_i32_0 : i32, i32
  }
  func.func @transform_2(%arg0: i32) -> (i32, i32) {
    %c0_i32 = arith.constant 0 : i32
    %c0_i32_0 = arith.constant 0 : i32
    %c0_i32_1 = arith.constant 0 : i32
    return %c0_i32, %c0_i32_0 : i32, i32
  }
  func.func @transform_3(%arg0: i32) -> (i32, i32) {
    %c0_i32 = arith.constant 0 : i32
    %c0_i32_0 = arith.constant 0 : i32
    %c0_i32_1 = arith.constant 0 : i32
    return %c0_i32, %c0_i32_0 : i32, i32
  }
  func.func @transform_4(%arg0: i32) -> (i32, i32) {
    %c0_i32 = arith.constant 0 : i32
    %c0_i32_0 = arith.constant 0 : i32
    %c0_i32_1 = arith.constant 0 : i32
    return %c0_i32, %c0_i32_0 : i32, i32
  }
  func.func @transform_5(%arg0: i32) -> (i32, i32) {
    %c0_i32 = arith.constant 0 : i32
    %c0_i32_0 = arith.constant 0 : i32
    return %c0_i32, %arg0 : i32, i32
  }
}

</mosaic_0001>

<bundles_post_ra>
// kernel: tpu_custom_call.1
= control target key start
LH: loop header
LB: loop body
LE: loop exit
PB: predicated region body
PF: predicated region fallthrough
CT: control target
= control target key end

     0   :  { %10 = vsyncpa [#allocation4], 0  ;;  %s988_s0 = inlined_call_operand.vmem [shape: f32[16,256], index: 0, kind: input, shape index: {}]   ;;  %s989_s1 = inlined_call_operand.vmem [shape: f32[48,16], index: 1, kind: input, shape index: {}]   ;;  %s990_s2 = inlined_call_operand.vmem [shape: f32[32,1], index: 2, kind: input, shape index: {}]   ;;  %s991_s3 = inlined_call_operand.vmem [shape: f32[16,32], index: 3, kind: input, shape index: {}]   ;;  %s992_s4 = inlined_call_operand.vmem [shape: f32[16,1], index: 4, kind: input, shape index: {}]   ;;  %s993_s5 = inlined_call_operand.hbm [shape: f32[16,256], index: 5, kind: output, shape index: {}]  }
   0x1   :  { %12 = vsyncpa [#allocation4 + $0x1], 0  ;;  %s822_s18 = smov 0   ;;  %s824_s19 = smov 0  }
   0x2   :  { %s826_s20 = smov 0   ;;  %s828_s21 = smov 0  }
   0x3 LB: > { %s595_s22 = sadd.s32 4294967295, %s785_s21   ;;  %s596_s23 = sadd.s32 4294967294, %s785_s21   ;;  %s785_s21 = sphi %s828_s21, %s999_s21   ;;  %s781_s20 = sphi %s826_s20, %s998_s20   ;;  %s777_s19 = sphi %s824_s19, %s997_s19   ;;  %s773_s18 = sphi %s822_s18, %s996_s18  }
   0x4   : > { %s845_s24 = sadd.s32 1, %s785_s21   ;;  %s25_s25 = sadd.s32 1, %s781_s20 }
   0x5   : > { %s22_s26 = ssub.s32 %s785_s21, %s845_s24  ;;  %p32_p0 = scmp.ne.s32.totalorder %s781_s20, %s777_s19 }
   0x6   : > { %p23_p1 = scmp.eq.s32.totalorder %s22_s26, 0  ;;  %p33_p2 = scmp.eq.s32.totalorder %s785_s21, 0 }
   0x7   : > { %p146_p3 = scmp.eq.s32.totalorder %s595_s22, 1  ;;  %p151_p4 = scmp.ne.s32.totalorder %s777_s19, %s773_s18 }
   0x8   : > { %s858_s27 = scalar_select %p23_p1, %s781_s20, %s25_s25  }
   0x9   : > { %p34_p5 = por %p33_p2, %p32_p0  ;;  %p860_p6 = por %p146_p3, %p32_p0 }
   0xa   : > { %p152_p7 = scmp.eq.s32.totalorder %s596_s23, 1  ;;  %p598_p9 = scmp.ge.s32.totalorder %s785_s21, 2 }
   0xc   : > { %p864_p8 = por %p152_p7, %p151_p4  ;;  %180 = sbr.rel (%p598_p9) target bundleno = 26 (0x1a), region = 32 }
  0x13   : > { %183 = sbr.rel (!%p34_p5) target bundleno = 26 (0x1a), region = 36  ;;  %s185_s30 = sand.u32 (%p34_p5), 1, %s781_s20  }
  0x14   : > { %s600_s6 = sshll.u32 (%p34_p5), %s785_s21, 3  ;;  %s599_s7 = sshll.u32 (%p34_p5), %s185_s30, 4 }
  0x15   : > { %s189_s10 = scalar_lea.vmem (%p34_p5), %s988_s0, %s600_s6  ;;  %s187_s11 = scalar_lea.vmem (%p34_p5), [#allocation2], %s599_s7 }
  0x16   : > { %v219_v0 = vld [vmem:[%s189_s10] sm:$0xff] (%p34_p5)  ;;  %v221_v1 = vld [vmem:[%s189_s10 + $0x10] sm:$0xff] (%p34_p5) }
  0x17   : > { %220 = vst [vmem:[%s187_s11] sm:$0xff] (%p34_p5), %v219_v0  ;;  %222 = vst [vmem:[%s187_s11 + $0x8] sm:$0xff] (%p34_p5), %v221_v1 }
  0x1a PF: > { %p601_p10 = scmp.ge.s32.totalorder %s785_s21, 1  ;;  %p227_p11 = scmp.lt.s32.totalorder %s785_s21, 3 }
  0x1c   : > { %p228_p12 = pnand %p601_p10, %p227_p11 }
  0x1d   : > { %s234_s12 = sand.u32 (!%p228_p12), 1, %s777_s19   ;;  %v263_v2 = vld [vmem:[%s989_s1] sm:$0xff] (!%p228_p12)  ;;  %vm269_vm0 = vcmask (!%p228_p12), 130048   ;;  %v787_v3 = vmov (!%p228_p12), 0   ;;  %v385_v4 = vld [vmem:[%s990_s2 + $0x10] sm:$0xff] (!%p228_p12)  ;;  %v386_v9 = vld [vmem:[%s990_s2 + $0x18] sm:$0xff] (!%p228_p12) }
  0x1e   : > { %231 = sbr.rel (%p228_p12) target bundleno = 510 (0x1fe), region = 74  ;;  %s884_s15 = sshll.u32 (!%p228_p12), %s234_s12, 4  ;;  %634 = vmatprep.mubr.msk.f32.mxu1 (!%p228_p12), %vm269_vm0, %v263_v2  ;;  %714 = vset.pattern.permute.xlu1 (!%p228_p12), %v787_v3  ;;  %v383_v5 = vld [vmem:[%s990_s2] sm:$0xff] (!%p228_p12)  ;;  %v384_v10 = vld [vmem:[%s990_s2 + $0x8] sm:$0xff] (!%p228_p12)  ;;  %v265_v12 = vld [vmem:[%s989_s1 + $0x10] sm:$0xff] (!%p228_p12)  ;;  %vm429_vm1 = vcmask (!%p228_p12), 261120  }
  0x1f   : > { %713 = vset.pattern.permute.xlu0 (!%p228_p12), %v787_v3  ;;  %s236_s26 = scalar_lea.vmem (!%p228_p12), [#allocation2], %s884_s15  ;;  %399 = vperm.xlu1 (!%p228_p12), %714, %v385_v4   ;;  %v264_v11 = vld [vmem:[%s989_s1 + $0x8] sm:$0xff] (!%p228_p12)  ;;  %v417_v14 = vld [vmem:[%s992_s4] sm:$0xff] (!%p228_p12)  ;;  %v266_v15 = vld [vmem:[%s989_s1 + $0x18] sm:$0xff] (!%p228_p12)  ;;  %s260_s14 = scalar_lea.vmem (!%p228_p12), [#allocation3], %s884_s15 }
  0x20   : > { %v261_v6 = vld [vmem:[%s236_s26] sm:$0xff] (!%p228_p12)  ;;  %v262_v7 = vld [vmem:[%s236_s26 + $0x8] sm:$0xff] (!%p228_p12)  ;;  %389 = vperm.xlu0 (!%p228_p12), %713, %v383_v5   ;;  %s528_s16 = sshll.u32 (!%p228_p12), %s260_s14, 4  ;;  %s613_s17 = sshll.u32 (!%p228_p12), %s595_s22, 7  ;;  %s937_s16 = int_to_ptr.vmem [resolvable:$true] %s528_s16 }
  0x21   : > { %v654_v8 = vpack.c.bf16 (!%p228_p12), %v262_v7, %v261_v6  ;;  %v418_v13 = vld [vmem:[%s992_s4 + $0x8] sm:$0xff] (!%p228_p12)  ;;  %v267_v16 = vld [vmem:[%s989_s1 + $0x20] sm:$0xff] (!%p228_p12)  ;;  %s942_s26 = scalar_lea.hbm (!%p228_p12), %s993_s5, %s613_s17  ;;  %s946_s22 = scalar_lea.sflag (!%p228_p12), [#allocation4], %s234_s12 }
  0x22   : > { %v268_v17 = vld [vmem:[%s989_s1 + $0x28] sm:$0xff] (!%p228_p12)  ;;  %v415_v18 = vld [vmem:[%s991_s3] sm:$0xff] (!%p228_p12)  ;;  %s723_s15 = scalar_lea.vmem (!%p228_p12), %s937_s16, 256  ;;  %s788_s30 = smov (!%p228_p12), [#allocation3]  }
  0x23   : > { %655 = vmatprep.subr.bf16.mxu1 (!%p228_p12), %v654_v8  ;;  %404 = vperm.xlu1 (!%p228_p12), %714, %v386_v9   ;;  %v416_v39 = vld [vmem:[%s991_s3 + $0x8] sm:$0xff] (!%p228_p12)  ;;  %p724_p13 = scmp.ne.s32.totalorder (!%p228_p12), %s937_s16, %s723_s15  ;;  %s727_s6 = sshll.u32 (!%p228_p12), %s788_s30, 4  ;;  %s728_s6 = int_to_ptr.vmem [resolvable:$false] %s727_s6 }
  0x24   : > { %657 = vmatpush3.bf16.msra.mxu1 (!%p228_p12), %v654_v8  ;;  %394 = vperm.xlu0 (!%p228_p12), %713, %v384_v10   ;;  %s729_s7 = scalar_lea.vmem (!%p228_p12), %s728_s6, 512  ;;  %p730_p2 = scmp.lt.s32.totalorder (!%p228_p12), %s937_s16, %s728_s6 }
  0x25   : > { %651 = vmatprep.mubr.msk.f32.mxu0 %vm429_vm1, %v415_v18  ;;  %p725_p0 = pnand %p724_p13, %p860_p6  ;;  %p731_p3 = scmp.lt.s32.totalorder %s729_s7, %s723_s15 }
  0x27   : > { %635 = vmatmul.mubr.msk.f32.vlgmr.msra.gmra.mrb[0].mxu1 %vm269_vm0, %v264_v11  ;;  %426 = vperm.xlu1 %714, %v418_v13   ;;  %p726_p1 = pneg %p725_p0  ;;  %p732_p4 = por %p731_p3, %p730_p2 }
  0x28   : > { %637 = vmatprep.mubr.msk.f32.mxu1 %vm269_vm0, %v265_v12  ;;  %421 = vperm.xlu0 %713, %v417_v14  }
  0x29   : > { %p733_p5 = pnand %p732_p4, %p726_p1 }
  0x2b   : > { %638 = vmatmul.mubr.msk.f32.gmra.mrb[2].mxu1 %vm269_vm0, %v266_v15 }
  0x2c   : > { %640 = vmatprep.mubr.msk.f32.mxu1 %vm269_vm0, %v267_v16 }
  0x2f   : > { %641 = vmatmul.mubr.msk.f32.gmra.mrb[4].mxu1 %vm269_vm0, %v268_v17 }
  0x9e   : > { %v400_v22 = vpop.permute.xlu1 %399 }
  0x9f   : > { %v390_v19 = vpop.permute.xlu0 %389 }
  0xa2   : > { %v405_v28 = vpop.permute.xlu1 %404 }
  0xa3   : > { %v395_v23 = vpop.permute.xlu0 %394 }
  0xa6   : > { %v427_v40 = vpop.permute.xlu1 %426 }
  0xa7   : > { %v422_v41 = vpop.permute.xlu0 %421 }
  0xfa   : > { %v636_v20 = vpop.f32.mrb[0].mxu1 }
  0xfb   : > { %v354_v21 = vpop.f32.mrb[1].mxu1  ;;  %v666_v42 = vadd.f32 %v636_v20, %v427_v40 }
  0xfc   : > { %v668_v43 = vadd.f32 %v422_v41, %v354_v21 }
  0xfe   : > { %v639_v24 = vpop.f32.mrb[2].mxu1 }
  0xff   : > { %v408_v25 = vadd.f32 %v639_v24, %v395_v23  ;;  %v364_v26 = vpop.f32.mrb[3].mxu1 }
 0x100   : > { %v407_v27 = vadd.f32 %v390_v19, %v364_v26 }
 0x101   : > { %715 = vtanh.f32 %v408_v25 }
 0x102   : > { %717 = vtanh.f32 %v407_v27  ;;  %v642_v29 = vpop.f32.mrb[4].mxu1 }
 0x103   : > { %v410_v30 = vadd.f32 %v642_v29, %v405_v28  ;;  %v374_v31 = vpop.f32.mrb[5].mxu1 }
 0x104   : > { %v409_v32 = vadd.f32 %v400_v22, %v374_v31 }
 0x105   : > { %719 = vtanh.f32 %v410_v30 }
 0x106   : > { %721 = vtanh.f32 %v409_v32 }
 0x10b   : > { %v716_v33 = vpop.eup %715 }
 0x10c   : > { %v718_v34 = vpop.eup %717 }
 0x10d   : > { %v658_v35 = vpack.c.bf16 %v716_v33, %v718_v34 }
 0x10f   : > { %v720_v36 = vpop.eup %719  ;;  %659 = vmatprep.subr.bf16.mxu0 %v658_v35 }
 0x110   : > { %v722_v37 = vpop.eup %721  ;;  %661 = vmatpush3.bf16.msra.mxu0 %v658_v35 }
 0x111   : > { %v662_v38 = vpack.c.bf16 %v720_v36, %v722_v37 }
 0x113   : > { %663 = vmatprep.subr.bf16.mxu0 %v662_v38 }
 0x114   : > { %665 = vmatpush3.bf16.msra.mxu0 %v662_v38 }
 0x117   : > { %652 = vmatmul.mubr.msk.f32.vlgmr.msra.gmra.mrb[0].mxu0 %vm429_vm1, %v416_v39 }
 0x1ea   : > { %v653_v44 = vpop.f32.mrb[0].mxu0 }
 0x1eb   : > { %v667_v45 = vadd.f32 %v666_v42, %v653_v44  ;;  %v502_v46 = vpop.f32.mrb[1].mxu0 }
 0x1ec   : > { %v669_v47 = vadd.f32 %v668_v43, %v502_v46 }
 0x1ed   : > { %514 = vst [vmem:[%s260_s14 + $0x8] sm:$0xff] %v667_v45 }
 0x1ee   : > { %513 = vst [vmem:[%s260_s14] sm:$0xff] %v669_v47 }
 0x1ef   : > { %736 = shalt.err (!%p733_p5)
}
 0x1f0   : > { %s737_s12 = scalar_lea.hbm %s942_s26, 256  ;;  %s741_s10 = scalar_lea.hbm %s993_s5, 512 }
 0x1f1   : > { %p738_p7 = scmp.ne.s32.totalorder %s942_s26, %s737_s12  ;;  %p742_p12 = scmp.lt.u32.totalorder %s942_s26, %s993_s5 }
 0x1f2   : > { %p743_p13 = scmp.lt.u32.totalorder %s741_s10, %s737_s12  ;;  %p745_p1 = scmp.lt.u32.totalorder %s737_s12, %s942_s26 }
 0x1f3   : > { %p739_p10 = pnand %p738_p7, %p860_p6 }
 0x1f4   : > { %p744_p0 = por %p743_p13, %p742_p12 }
 0x1f5   : > { %p740_p11 = pneg %p739_p10 }
 0x1f6   : > { %p746_p2 = por %p745_p1, %p744_p0 }
 0x1f8   : > { %p747_p3 = pnand %p746_p2, %p740_p11 }
 0x1fa   : > { %750 = shalt.err (!%p747_p3)
}
 0x1fb   : > { %s789_s14 = smov 128   ;;  %s790_s17 = smov 256  }
 0x1fc   : > { %s791_s23 = smov 8  }
 0x1fd   : > { %670 = dma.vmem_to_hbm [thread:$0]  (%p860_p6), %s937_s16, 256, %s942_s26, %s946_s22, %s789_s14, %s790_s17, %s791_s23  }
 0x1fe PF: > { %s543_s25 = sand.u32 1, %s773_s18   ;;  %p673_p4 = pnand %p598_p9, %p864_p8 }
 0x1ff   : > { %s544_s15 = scalar_lea.sflag [#allocation4], %s543_s25 }
 0x200   : > { %768 = dma.done.wait (!%p673_p4), %s544_s15, 256  }
 0x201   : > { %770 = vsyncadd (!%p673_p4), %s544_s15, 4294967040  ;;  %p15_p5 = scmp.ge.s32.totalorder %s845_s24, 4   ;;  %s996_s18 = smov %s777_s19 }
 0x202   : > { %s997_s19 = smov %s781_s20  ;;  %s998_s20 = smov %s858_s27 }
 0x203   : > { %s999_s21 = smov %s845_s24  ;;  %17 = sbr.rel (!%p15_p5) target bundleno = 3 (0x3), region = 118 }
 0x20a   :  { %549 = vsyncpa [#allocation4], 1 }
 0x20b   :  { %551 = vsyncpa [#allocation4 + $0x1], 1 }

</bundles_post_ra>
